<compile_context>
chip_gen: v6e
topology: v6e:2x2x1
jax: 0.10.0
libtpu: 0.0.40
codegen_flags: <defaults>
</compile_context>

<pallas_src>
import jax
import jax.numpy as jnp
from jax.experimental import pallas as pl
from jax.experimental.pallas import tpu as pltpu


def _cls_head_kernel(x_ref, w_ref, b_ref, o_ref):
    """One grid step: project tb batch rows to logits on the MXU.

    x_ref: (tb, F)  activation tile, native dtype (f32 or bf16)
    w_ref: (F, C)   linear weight, resident across the grid
    b_ref: (1, C)   bias (f32)
    o_ref: (tb, C)  output logits tile (f32)
    """
    acc = jnp.dot(x_ref[...], w_ref[...], preferred_element_type=jnp.float32)
    o_ref[...] = (acc + b_ref[...]).astype(o_ref.dtype)


def _round_up(x, m):
    return ((x + m - 1) // m) * m


def _vmem_capacity_bytes():
    """Physical VMEM per TensorCore; conservative fallback if query fails."""
    try:
        return int(pltpu.get_tpu_info().vmem_capacity_bytes)
    except Exception:
        return 64 << 20  # v7x per-TC size -> safe lower bound on all chips


def _choose_tb(batch, row_bytes, x_budget_bytes):
    """Rows per grid step.

    - Fill the double-buffered x-tile budget.
    - Keep tb a multiple of 8 (sublane alignment for the 2D (tb, F) block).
    - Keep >= 4 grid steps when the batch is large enough, so on v7x each of
      the 2 TensorCores still gets >= 2 steps of DMA/compute overlap.
    """
    tb = max(8, (x_budget_bytes // (2 * max(1, row_bytes))) // 8 * 8)
    batch_pad8 = _round_up(batch, 8)
    if batch_pad8 >= 4 * 8:
        tb = min(tb, _round_up(pl.cdiv(batch_pad8, 4), 8))
    return min(tb, batch_pad8)


def classification_head(x, weight, bias, *, tb=None):
    """x: [B, V, D, P] (native PyTorch layout, native dtype).
    weight: [n_classes, V*D*P] (PyTorch nn.Linear layout), bias: [n_classes].
    Returns logits [B, n_classes] (float32)."""
    B, V, D, P = x.shape
    F = V * D * P
    C = weight.shape[0]
    assert weight.shape == (C, F) and bias.shape == (C,)

    # Free contiguous reshape: PyTorch Flatten(start_dim=1) order is (v, d, p).
    x2 = x.reshape(B, F)
    # One-time small parameter prep: (C, F) -> (F, C) so the kernel is x @ w.
    wT = weight.T
    b2 = bias.reshape(1, C).astype(jnp.float32)

    cap = _vmem_capacity_bytes()
    x_budget = min(cap // 3, 32 << 20)  # ~21 MiB on v7x, 32 MiB on v5e/v6e
    if tb is None:
        tb = _choose_tb(B, F * x.dtype.itemsize, x_budget)

    # Pad the batch up to a multiple of tb (keeps tiles large for awkward B).
    B_pad = _round_up(B, tb)
    if B_pad != B:
        x2 = jnp.pad(x2, ((0, B_pad - B), (0, 0)))
    grid = B_pad // tb

    # Account for every VMEM resident: double-buffered x tile, weight (default
    # 2 buffers, tiny), output tile, bias, plus headroom for MXU temporaries.
    vmem_need = (2 * tb * F * x2.dtype.itemsize
                 + 2 * F * C * wT.dtype.itemsize
                 + 2 * tb * C * 4
                 + 2 * C * 4
                 + (2 << 20))
    vmem_limit = int(min(max(vmem_need, 16 << 20), cap * 3 // 4))

    out = pl.pallas_call(
        _cls_head_kernel,
        out_shape=jax.ShapeDtypeStruct((B_pad, C), jnp.float32),
        grid_spec=pltpu.PrefetchScalarGridSpec(
            num_scalar_prefetch=0,
            grid=(grid,),
            in_specs=[
                pl.BlockSpec((tb, F), lambda i: (i, 0)),   # activations
                pl.BlockSpec((F, C), lambda i: (0, 0)),    # weight (resident)
                pl.BlockSpec((1, C), lambda i: (0, 0)),    # bias
            ],
            out_specs=pl.BlockSpec((tb, C), lambda i: (i, 0)),
        ),
        compiler_params=pltpu.CompilerParams(
            dimension_semantics=("parallel",),
            vmem_limit_bytes=vmem_limit),
    )(x2, wT, b2)

    return out[:B]


def _reference(x, weight, bias):
    B = x.shape[0]
    xf = x.reshape(B, -1).astype(jnp.float32)
    return xf @ weight.astype(jnp.float32).T + bias.astype(jnp.float32)


if __name__ == "__main__":
    # Shapes implied by forward: x = [bs, n_vars, d_model, num_patch]
    B, V, D, P = 2, 4, 32, 16
    C = 3                      # n_classes
    F = V * D * P

    key = jax.random.PRNGKey(0)
    kx, kw, kb = jax.random.split(key, 3)

    x = jax.random.normal(kx, (B, V, D, P), dtype=jnp.float32)
    weight = 0.02 * jax.random.normal(kw, (C, F), dtype=jnp.float32)  # nn.Linear weight
    bias = 0.05 * jax.random.normal(kb, (C,), dtype=jnp.float32)      # nn.Linear bias

    # Dropout is identity in eval mode, so it is intentionally a no-op here.
    out = classification_head(x, weight, bias)
    out = jax.block_until_ready(out)

    ref = _reference(x, weight, bias)
    assert out.shape == (B, C), out.shape
    assert jnp.allclose(out, ref, rtol=1e-4, atol=1e-4), (out, ref)
    print("KERNEL_OK")
</pallas_src>

<mosaic_0001>
module attributes {stable_mosaic.version = 11 : i64} {
  func.func @_cls_head_kernel(%arg0: i32, %arg1: memref<8x2048xf32, #tpu.memory_space<vmem>>, %arg2: memref<2048x3xf32, #tpu.memory_space<vmem>>, %arg3: memref<1x3xf32, #tpu.memory_space<vmem>>, %arg4: memref<8x3xf32, #tpu.memory_space<vmem>>) attributes {dimension_semantics = [#tpu.dimension_semantics<parallel>], iteration_bounds = array<i64: 1>, scalar_prefetch = 0 : i64, scratch_operands = 0 : i64, tpu.core_type = #tpu.core_type<tc>, window_params = [{transform_indices = @transform_0, window_bounds = array<i64: 8, 2048>}, {pipeline_mode = #tpu.pipeline_mode<synchronous>, transform_indices = @transform_1, window_bounds = array<i64: 2048, 3>}, {pipeline_mode = #tpu.pipeline_mode<synchronous>, transform_indices = @transform_2, window_bounds = array<i64: 1, 3>}, {transform_indices = @transform_3, window_bounds = array<i64: 8, 3>}]} {
    %c0 = arith.constant 0 : index
    %c0_0 = arith.constant 0 : index
    %0 = vector.load %arg1[%c0, %c0_0] : memref<8x2048xf32, #tpu.memory_space<vmem>>, vector<8x2048xf32>
    %c0_1 = arith.constant 0 : index
    %c0_2 = arith.constant 0 : index
    %1 = vector.load %arg2[%c0_1, %c0_2] : memref<2048x3xf32, #tpu.memory_space<vmem>>, vector<2048x3xf32>
    %cst = arith.constant dense<0.000000e+00> : vector<8x3xf32>
    %2 = tpu.matmul %0, %1, %cst {dimension_numbers = #tpu.dot_dimension_numbers<[1], [0], [0], [1], [0, 0, 1, 1], [], []>} : vector<8x2048xf32>, vector<2048x3xf32>, vector<8x3xf32> -> vector<8x3xf32>
    %c0_3 = arith.constant 0 : index
    %c0_4 = arith.constant 0 : index
    %3 = vector.load %arg3[%c0_3, %c0_4] : memref<1x3xf32, #tpu.memory_space<vmem>>, vector<1x3xf32>
    %4 = vector.broadcast %3 : vector<1x3xf32> to vector<8x3xf32>
    %5 = arith.addf %2, %4 : vector<8x3xf32>
    %c0_5 = arith.constant 0 : index
    %c0_6 = arith.constant 0 : index
    %6 = vector.load %arg4[%c0_5, %c0_6] : memref<8x3xf32, #tpu.memory_space<vmem>>, vector<8x3xf32>
    tpu.vector_store %arg4[%c0_5, %c0_6], %5 {strides = array<i32>} : memref<8x3xf32, #tpu.memory_space<vmem>>, vector<8x3xf32>,
    return
  }
  func.func @transform_0(%arg0: i32) -> (i32, i32) {
    %c0_i32 = arith.constant 0 : i32
    %c0_i32_0 = arith.constant 0 : i32
    return %arg0, %c0_i32 : i32, i32
  }
  func.func @transform_1(%arg0: i32) -> (i32, i32) {
    %c0_i32 = arith.constant 0 : i32
    %c0_i32_0 = arith.constant 0 : i32
    %c0_i32_1 = arith.constant 0 : i32
    return %c0_i32, %c0_i32_0 : i32, i32
  }
  func.func @transform_2(%arg0: i32) -> (i32, i32) {
    %c0_i32 = arith.constant 0 : i32
    %c0_i32_0 = arith.constant 0 : i32
    %c0_i32_1 = arith.constant 0 : i32
    return %c0_i32, %c0_i32_0 : i32, i32
  }
  func.func @transform_3(%arg0: i32) -> (i32, i32) {
    %c0_i32 = arith.constant 0 : i32
    %c0_i32_0 = arith.constant 0 : i32
    return %arg0, %c0_i32 : i32, i32
  }
}

</mosaic_0001>

<bundles_post_ra>
// kernel: tpu_custom_call.1
= control target key start
LH: loop header
LB: loop body
LE: loop exit
PB: predicated region body
PF: predicated region fallthrough
CT: control target
= control target key end

     0   :  { %vm853_vm0 = vcmask 23552   ;;  %s1982_s1 = inlined_call_operand.vmem [shape: f32[2048,3], index: 1, kind: input, shape index: {}]   ;;  %s1983_s0 = inlined_call_operand.vmem [shape: f32[8,2048], index: 0, kind: input, shape index: {}]   ;;  %s1984_s2 = inlined_call_operand.vmem [shape: f32[1,3], index: 2, kind: input, shape index: {}]   ;;  %s1985_s3 = inlined_call_operand.vmem [shape: f32[8,3], index: 3, kind: output, shape index: {}]  }
   0x1   :  { %v61_v0 = vld [vmem:[%s1982_s1 + $0xf8] sm:$0xff]  ;;  %v60_v4 = vld [vmem:[%s1982_s1 + $0xf0] sm:$0xff]  ;;  %v59_v8 = vld [vmem:[%s1982_s1 + $0xe8] sm:$0xff] }
   0x2   :  { %v93_v1 = vld [vmem:[%s1982_s1 + $0x1f8] sm:$0xff]  ;;  %860 = vmatprep.subr.mxu0 %v61_v0  ;;  %v92_v5 = vld [vmem:[%s1982_s1 + $0x1f0] sm:$0xff]  ;;  %v91_v9 = vld [vmem:[%s1982_s1 + $0x1e8] sm:$0xff] }
   0x3   :  { %v45_v2 = vld [vmem:[%s1982_s1 + $0x78] sm:$0xff]  ;;  %895 = vmatprep.subr.mxu1 %v93_v1  ;;  %v44_v6 = vld [vmem:[%s1982_s1 + $0x70] sm:$0xff]  ;;  %v43_v10 = vld [vmem:[%s1982_s1 + $0x68] sm:$0xff] }
   0x4   :  { %v77_v3 = vld [vmem:[%s1982_s1 + $0x178] sm:$0xff]  ;;  %861 = vmatpush3.msra.mxu0 %v45_v2  ;;  %v76_v7 = vld [vmem:[%s1982_s1 + $0x170] sm:$0xff]  ;;  %v75_v11 = vld [vmem:[%s1982_s1 + $0x168] sm:$0xff] }
   0x5   :  { %896 = vmatpush3.msra.mxu1 %v77_v3  ;;  %862 = vmatprep.subr.mxu0 %v60_v4  ;;  %v58_v12 = vld [vmem:[%s1982_s1 + $0xe0] sm:$0xff]  ;;  %v57_v16 = vld [vmem:[%s1982_s1 + $0xd8] sm:$0xff]  ;;  %v56_v20 = vld [vmem:[%s1982_s1 + $0xd0] sm:$0xff] }
   0x6   :  { %897 = vmatprep.subr.mxu1 %v92_v5  ;;  %863 = vmatpush3.msra.mxu0 %v44_v6  ;;  %v90_v13 = vld [vmem:[%s1982_s1 + $0x1e0] sm:$0xff]  ;;  %v89_v17 = vld [vmem:[%s1982_s1 + $0x1d8] sm:$0xff]  ;;  %v88_v21 = vld [vmem:[%s1982_s1 + $0x1d0] sm:$0xff] }
   0x7   :  { %898 = vmatpush3.msra.mxu1 %v76_v7  ;;  %864 = vmatprep.subr.mxu0 %v59_v8  ;;  %v42_v14 = vld [vmem:[%s1982_s1 + $0x60] sm:$0xff]  ;;  %v41_v18 = vld [vmem:[%s1982_s1 + $0x58] sm:$0xff]  ;;  %v40_v22 = vld [vmem:[%s1982_s1 + $0x50] sm:$0xff] }
   0x8   :  { %899 = vmatprep.subr.mxu1 %v91_v9  ;;  %v74_v15 = vld [vmem:[%s1982_s1 + $0x160] sm:$0xff]  ;;  %865 = vmatpush3.msra.mxu0 %v43_v10  ;;  %v73_v19 = vld [vmem:[%s1982_s1 + $0x158] sm:$0xff]  ;;  %v72_v23 = vld [vmem:[%s1982_s1 + $0x150] sm:$0xff] }
   0x9   :  { %900 = vmatpush3.msra.mxu1 %v75_v11  ;;  %866 = vmatprep.subr.mxu0 %v58_v12  ;;  %v55_v24 = vld [vmem:[%s1982_s1 + $0xc8] sm:$0xff]  ;;  %v54_v28 = vld [vmem:[%s1982_s1 + $0xc0] sm:$0xff]  ;;  %v53_v32 = vld [vmem:[%s1982_s1 + $0xb8] sm:$0xff] }
   0xa   :  { %901 = vmatprep.subr.mxu1 %v90_v13  ;;  %867 = vmatpush3.msra.mxu0 %v42_v14  ;;  %v87_v25 = vld [vmem:[%s1982_s1 + $0x1c8] sm:$0xff]  ;;  %v86_v29 = vld [vmem:[%s1982_s1 + $0x1c0] sm:$0xff]  ;;  %v85_v33 = vld [vmem:[%s1982_s1 + $0x1b8] sm:$0xff] }
   0xb   :  { %902 = vmatpush3.msra.mxu1 %v74_v15  ;;  %868 = vmatprep.subr.mxu0 %v57_v16  ;;  %v39_v26 = vld [vmem:[%s1982_s1 + $0x48] sm:$0xff]  ;;  %v38_v30 = vld [vmem:[%s1982_s1 + $0x40] sm:$0xff]  ;;  %v37_v34 = vld [vmem:[%s1982_s1 + $0x38] sm:$0xff] }
   0xc   :  { %903 = vmatprep.subr.mxu1 %v89_v17  ;;  %869 = vmatpush3.msra.mxu0 %v41_v18  ;;  %v71_v27 = vld [vmem:[%s1982_s1 + $0x148] sm:$0xff]  ;;  %v70_v31 = vld [vmem:[%s1982_s1 + $0x140] sm:$0xff]  ;;  %v69_v35 = vld [vmem:[%s1982_s1 + $0x138] sm:$0xff] }
   0xd   :  { %904 = vmatpush3.msra.mxu1 %v73_v19  ;;  %870 = vmatprep.subr.mxu0 %v56_v20  ;;  %v52_v36 = vld [vmem:[%s1982_s1 + $0xb0] sm:$0xff]  ;;  %v51_v40 = vld [vmem:[%s1982_s1 + $0xa8] sm:$0xff]  ;;  %v50_v44 = vld [vmem:[%s1982_s1 + $0xa0] sm:$0xff] }
   0xe   :  { %905 = vmatprep.subr.mxu1 %v88_v21  ;;  %871 = vmatpush3.msra.mxu0 %v40_v22  ;;  %v84_v37 = vld [vmem:[%s1982_s1 + $0x1b0] sm:$0xff]  ;;  %v83_v41 = vld [vmem:[%s1982_s1 + $0x1a8] sm:$0xff]  ;;  %v82_v45 = vld [vmem:[%s1982_s1 + $0x1a0] sm:$0xff] }
   0xf   :  { %906 = vmatpush3.msra.mxu1 %v72_v23  ;;  %872 = vmatprep.subr.mxu0 %v55_v24  ;;  %v36_v38 = vld [vmem:[%s1982_s1 + $0x30] sm:$0xff]  ;;  %v35_v42 = vld [vmem:[%s1982_s1 + $0x28] sm:$0xff]  ;;  %v34_v46 = vld [vmem:[%s1982_s1 + $0x20] sm:$0xff] }
  0x10   :  { %907 = vmatprep.subr.mxu1 %v87_v25  ;;  %873 = vmatpush3.msra.mxu0 %v39_v26  ;;  %v68_v39 = vld [vmem:[%s1982_s1 + $0x130] sm:$0xff]  ;;  %v67_v43 = vld [vmem:[%s1982_s1 + $0x128] sm:$0xff]  ;;  %v66_v47 = vld [vmem:[%s1982_s1 + $0x120] sm:$0xff] }
  0x11   :  { %908 = vmatpush3.msra.mxu1 %v71_v27  ;;  %874 = vmatprep.subr.mxu0 %v54_v28  ;;  %v49_v48 = vld [vmem:[%s1982_s1 + $0x98] sm:$0xff]  ;;  %v48_v52 = vld [vmem:[%s1982_s1 + $0x90] sm:$0xff]  ;;  %v47_v56 = vld [vmem:[%s1982_s1 + $0x88] sm:$0xff] }
  0x12   :  { %909 = vmatprep.subr.mxu1 %v86_v29  ;;  %875 = vmatpush3.msra.mxu0 %v38_v30  ;;  %v81_v49 = vld [vmem:[%s1982_s1 + $0x198] sm:$0xff]  ;;  %v80_v53 = vld [vmem:[%s1982_s1 + $0x190] sm:$0xff]  ;;  %v79_v57 = vld [vmem:[%s1982_s1 + $0x188] sm:$0xff] }
  0x13   :  { %910 = vmatpush3.msra.mxu1 %v70_v31  ;;  %876 = vmatprep.subr.mxu0 %v53_v32  ;;  %v33_v50 = vld [vmem:[%s1982_s1 + $0x18] sm:$0xff]  ;;  %v32_v54 = vld [vmem:[%s1982_s1 + $0x10] sm:$0xff]  ;;  %v31_v58 = vld [vmem:[%s1982_s1 + $0x8] sm:$0xff] }
  0x14   :  { %911 = vmatprep.subr.mxu1 %v85_v33  ;;  %877 = vmatpush3.msra.mxu0 %v37_v34  ;;  %v65_v51 = vld [vmem:[%s1982_s1 + $0x118] sm:$0xff]  ;;  %v64_v55 = vld [vmem:[%s1982_s1 + $0x110] sm:$0xff]  ;;  %v63_v59 = vld [vmem:[%s1982_s1 + $0x108] sm:$0xff] }
  0x15   :  { %912 = vmatpush3.msra.mxu1 %v69_v35  ;;  %878 = vmatprep.subr.mxu0 %v52_v36  ;;  %v46_v60 = vld [vmem:[%s1982_s1 + $0x80] sm:$0xff]  ;;  %v15_v63 = vld [vmem:[%s1983_s0 + $0x8] sm:$0xff]  ;;  %v17_v2 = vld [vmem:[%s1983_s0 + $0x18] sm:$0xff] }
  0x16   :  { %913 = vmatprep.subr.mxu1 %v84_v37  ;;  %879 = vmatpush3.msra.mxu0 %v36_v38  ;;  %v78_v61 = vld [vmem:[%s1982_s1 + $0x180] sm:$0xff]  ;;  %v125_v3 = vld [vmem:[%s1982_s1 + $0x2f8] sm:$0xff]  ;;  %v16_v5 = vld [vmem:[%s1983_s0 + $0x10] sm:$0xff] }
  0x17   :  { %914 = vmatpush3.msra.mxu1 %v68_v39  ;;  %880 = vmatprep.subr.mxu0 %v51_v40  ;;  %v30_v62 = vld [vmem:[%s1982_s1] sm:$0xff]  ;;  %v157_v4 = vld [vmem:[%s1982_s1 + $0x3f8] sm:$0xff]  ;;  %v124_v8 = vld [vmem:[%s1982_s1 + $0x2f0] sm:$0xff] }
  0x18   :  { %915 = vmatprep.subr.mxu1 %v83_v41  ;;  %881 = vmatpush3.msra.mxu0 %v35_v42  ;;  %v62_v0 = vld [vmem:[%s1982_s1 + $0x100] sm:$0xff]  ;;  %v109_v6 = vld [vmem:[%s1982_s1 + $0x278] sm:$0xff]  ;;  %v156_v9 = vld [vmem:[%s1982_s1 + $0x3f0] sm:$0xff] }
  0x19   :  { %916 = vmatpush3.msra.mxu1 %v67_v43  ;;  %882 = vmatprep.subr.mxu0 %v50_v44  ;;  %v14_v1 = vld [vmem:[%s1983_s0] sm:$0xff]  ;;  %v141_v7 = vld [vmem:[%s1982_s1 + $0x378] sm:$0xff]  ;;  %v108_v10 = vld [vmem:[%s1982_s1 + $0x270] sm:$0xff] }
  0x1a   :  { %917 = vmatprep.subr.mxu1 %v82_v45  ;;  %883 = vmatpush3.msra.mxu0 %v34_v46  ;;  %v140_v11 = vld [vmem:[%s1982_s1 + $0x370] sm:$0xff]  ;;  %v123_v12 = vld [vmem:[%s1982_s1 + $0x2e8] sm:$0xff]  ;;  %v122_v16 = vld [vmem:[%s1982_s1 + $0x2e0] sm:$0xff] }
  0x1b   :  { %918 = vmatpush3.msra.mxu1 %v66_v47  ;;  %884 = vmatprep.subr.mxu0 %v49_v48  ;;  %v155_v13 = vld [vmem:[%s1982_s1 + $0x3e8] sm:$0xff]  ;;  %v154_v17 = vld [vmem:[%s1982_s1 + $0x3e0] sm:$0xff]  ;;  %v121_v20 = vld [vmem:[%s1982_s1 + $0x2d8] sm:$0xff] }
  0x1c   :  { %919 = vmatprep.subr.mxu1 %v81_v49  ;;  %885 = vmatpush3.msra.mxu0 %v33_v50  ;;  %v107_v14 = vld [vmem:[%s1982_s1 + $0x268] sm:$0xff]  ;;  %v106_v18 = vld [vmem:[%s1982_s1 + $0x260] sm:$0xff]  ;;  %v153_v21 = vld [vmem:[%s1982_s1 + $0x3d8] sm:$0xff] }
  0x1d   :  { %920 = vmatpush3.msra.mxu1 %v65_v51  ;;  %886 = vmatprep.subr.mxu0 %v48_v52  ;;  %v139_v15 = vld [vmem:[%s1982_s1 + $0x368] sm:$0xff]  ;;  %v138_v19 = vld [vmem:[%s1982_s1 + $0x360] sm:$0xff]  ;;  %v105_v22 = vld [vmem:[%s1982_s1 + $0x258] sm:$0xff] }
  0x1e   :  { %921 = vmatprep.subr.mxu1 %v80_v53  ;;  %887 = vmatpush3.msra.mxu0 %v32_v54  ;;  %v137_v23 = vld [vmem:[%s1982_s1 + $0x358] sm:$0xff]  ;;  %v120_v24 = vld [vmem:[%s1982_s1 + $0x2d0] sm:$0xff]  ;;  %v119_v28 = vld [vmem:[%s1982_s1 + $0x2c8] sm:$0xff] }
  0x1f   :  { %922 = vmatpush3.msra.mxu1 %v64_v55  ;;  %888 = vmatprep.subr.mxu0 %v47_v56  ;;  %v152_v25 = vld [vmem:[%s1982_s1 + $0x3d0] sm:$0xff]  ;;  %v151_v29 = vld [vmem:[%s1982_s1 + $0x3c8] sm:$0xff]  ;;  %v118_v32 = vld [vmem:[%s1982_s1 + $0x2c0] sm:$0xff] }
  0x20   :  { %923 = vmatprep.subr.mxu1 %v79_v57  ;;  %889 = vmatpush3.msra.mxu0 %v31_v58  ;;  %v104_v26 = vld [vmem:[%s1982_s1 + $0x250] sm:$0xff]  ;;  %v103_v30 = vld [vmem:[%s1982_s1 + $0x248] sm:$0xff]  ;;  %v150_v33 = vld [vmem:[%s1982_s1 + $0x3c0] sm:$0xff] }
  0x21   :  { %924 = vmatpush3.msra.mxu1 %v63_v59  ;;  %890 = vmatprep.subr.mxu0 %v46_v60  ;;  %v136_v27 = vld [vmem:[%s1982_s1 + $0x350] sm:$0xff]  ;;  %v135_v31 = vld [vmem:[%s1982_s1 + $0x348] sm:$0xff]  ;;  %v102_v34 = vld [vmem:[%s1982_s1 + $0x240] sm:$0xff] }
  0x22   :  { %925 = vmatprep.subr.mxu1 %v78_v61  ;;  %891 = vmatpush3.msra.mxu0 %v30_v62  ;;  %v134_v35 = vld [vmem:[%s1982_s1 + $0x340] sm:$0xff]  ;;  %v117_v36 = vld [vmem:[%s1982_s1 + $0x2b8] sm:$0xff]  ;;  %v116_v40 = vld [vmem:[%s1982_s1 + $0x2b0] sm:$0xff] }
  0x23   :  { %357 = vmatprep.mubr.f32.mxu0 %v15_v63  ;;  %926 = vmatpush3.msra.mxu1 %v62_v0  ;;  %v149_v37 = vld [vmem:[%s1982_s1 + $0x3b8] sm:$0xff]  ;;  %v148_v41 = vld [vmem:[%s1982_s1 + $0x3b0] sm:$0xff]  ;;  %v115_v44 = vld [vmem:[%s1982_s1 + $0x2a8] sm:$0xff] }
  0x24   :  { %358 = vmatmul.mubr.f32.vlgmr.msra.gmra.mxu0 %v14_v1  ;;  %427 = vmatprep.mubr.f32.mxu1 %v17_v2  ;;  %v101_v38 = vld [vmem:[%s1982_s1 + $0x238] sm:$0xff]  ;;  %v100_v42 = vld [vmem:[%s1982_s1 + $0x230] sm:$0xff]  ;;  %v147_v45 = vld [vmem:[%s1982_s1 + $0x3a8] sm:$0xff] }
  0x25   :  { %930 = vmatprep.subr.mxu0 %v125_v3  ;;  %965 = vmatprep.subr.mxu1 %v157_v4  ;;  %v133_v39 = vld [vmem:[%s1982_s1 + $0x338] sm:$0xff]  ;;  %v132_v43 = vld [vmem:[%s1982_s1 + $0x330] sm:$0xff]  ;;  %v99_v46 = vld [vmem:[%s1982_s1 + $0x228] sm:$0xff] }
  0x26   :  { %428 = vmatmul.mubr.f32.vlgmr.msra.gmra.mxu1 %v16_v5  ;;  %931 = vmatpush3.msra.mxu0 %v109_v6  ;;  %v131_v47 = vld [vmem:[%s1982_s1 + $0x328] sm:$0xff]  ;;  %v114_v48 = vld [vmem:[%s1982_s1 + $0x2a0] sm:$0xff]  ;;  %v113_v52 = vld [vmem:[%s1982_s1 + $0x298] sm:$0xff] }
  0x27   :  { %966 = vmatpush3.msra.mxu1 %v141_v7  ;;  %932 = vmatprep.subr.mxu0 %v124_v8  ;;  %v146_v49 = vld [vmem:[%s1982_s1 + $0x3a0] sm:$0xff]  ;;  %v145_v53 = vld [vmem:[%s1982_s1 + $0x398] sm:$0xff]  ;;  %v112_v56 = vld [vmem:[%s1982_s1 + $0x290] sm:$0xff] }
  0x28   :  { %967 = vmatprep.subr.mxu1 %v156_v9  ;;  %933 = vmatpush3.msra.mxu0 %v108_v10  ;;  %v98_v50 = vld [vmem:[%s1982_s1 + $0x220] sm:$0xff]  ;;  %v97_v54 = vld [vmem:[%s1982_s1 + $0x218] sm:$0xff]  ;;  %v144_v57 = vld [vmem:[%s1982_s1 + $0x390] sm:$0xff] }
  0x29   :  { %968 = vmatpush3.msra.mxu1 %v140_v11  ;;  %934 = vmatprep.subr.mxu0 %v123_v12  ;;  %v130_v51 = vld [vmem:[%s1982_s1 + $0x320] sm:$0xff]  ;;  %v129_v55 = vld [vmem:[%s1982_s1 + $0x318] sm:$0xff]  ;;  %v96_v58 = vld [vmem:[%s1982_s1 + $0x210] sm:$0xff] }
  0x2a   :  { %969 = vmatprep.subr.mxu1 %v155_v13  ;;  %935 = vmatpush3.msra.mxu0 %v107_v14  ;;  %v128_v59 = vld [vmem:[%s1982_s1 + $0x310] sm:$0xff]  ;;  %v111_v60 = vld [vmem:[%s1982_s1 + $0x288] sm:$0xff]  ;;  %v110_v0 = vld [vmem:[%s1982_s1 + $0x280] sm:$0xff] }
  0x2b   :  { %970 = vmatpush3.msra.mxu1 %v139_v15  ;;  %936 = vmatprep.subr.mxu0 %v122_v16  ;;  %v143_v61 = vld [vmem:[%s1982_s1 + $0x388] sm:$0xff]  ;;  %v142_v1 = vld [vmem:[%s1982_s1 + $0x380] sm:$0xff]  ;;  %v21_v6 = vld [vmem:[%s1983_s0 + $0x38] sm:$0xff] }
  0x2c   :  { %971 = vmatprep.subr.mxu1 %v154_v17  ;;  %937 = vmatpush3.msra.mxu0 %v106_v18  ;;  %v95_v62 = vld [vmem:[%s1982_s1 + $0x208] sm:$0xff]  ;;  %v94_v2 = vld [vmem:[%s1982_s1 + $0x200] sm:$0xff]  ;;  %v189_v7 = vld [vmem:[%s1982_s1 + $0x4f8] sm:$0xff] }
  0x2d   :  { %972 = vmatpush3.msra.mxu1 %v138_v19  ;;  %938 = vmatprep.subr.mxu0 %v121_v20  ;;  %v127_v63 = vld [vmem:[%s1982_s1 + $0x308] sm:$0xff]  ;;  %v126_v4 = vld [vmem:[%s1982_s1 + $0x300] sm:$0xff]  ;;  %v221_v8 = vld [vmem:[%s1982_s1 + $0x5f8] sm:$0xff] }
  0x2e   :  { %973 = vmatprep.subr.mxu1 %v153_v21  ;;  %939 = vmatpush3.msra.mxu0 %v105_v22  ;;  %v19_v3 = vld [vmem:[%s1983_s0 + $0x28] sm:$0xff]  ;;  %v18_v5 = vld [vmem:[%s1983_s0 + $0x20] sm:$0xff]  ;;  %v20_v9 = vld [vmem:[%s1983_s0 + $0x30] sm:$0xff] }
  0x2f   :  { %974 = vmatpush3.msra.mxu1 %v137_v23  ;;  %940 = vmatprep.subr.mxu0 %v120_v24  ;;  %v173_v10 = vld [vmem:[%s1982_s1 + $0x478] sm:$0xff]  ;;  %v188_v12 = vld [vmem:[%s1982_s1 + $0x4f0] sm:$0xff]  ;;  %v187_v16 = vld [vmem:[%s1982_s1 + $0x4e8] sm:$0xff] }
  0x30   :  { %975 = vmatprep.subr.mxu1 %v152_v25  ;;  %941 = vmatpush3.msra.mxu0 %v104_v26  ;;  %v205_v11 = vld [vmem:[%s1982_s1 + $0x578] sm:$0xff]  ;;  %v220_v13 = vld [vmem:[%s1982_s1 + $0x5f0] sm:$0xff]  ;;  %v219_v17 = vld [vmem:[%s1982_s1 + $0x5e8] sm:$0xff] }
  0x31   :  { %976 = vmatpush3.msra.mxu1 %v136_v27  ;;  %942 = vmatprep.subr.mxu0 %v119_v28  ;;  %v172_v14 = vld [vmem:[%s1982_s1 + $0x470] sm:$0xff]  ;;  %v171_v18 = vld [vmem:[%s1982_s1 + $0x468] sm:$0xff]  ;;  %v186_v20 = vld [vmem:[%s1982_s1 + $0x4e0] sm:$0xff] }
  0x32   :  { %977 = vmatprep.subr.mxu1 %v151_v29  ;;  %943 = vmatpush3.msra.mxu0 %v103_v30  ;;  %v204_v15 = vld [vmem:[%s1982_s1 + $0x570] sm:$0xff]  ;;  %v203_v19 = vld [vmem:[%s1982_s1 + $0x568] sm:$0xff]  ;;  %v218_v21 = vld [vmem:[%s1982_s1 + $0x5e0] sm:$0xff] }
  0x33   :  { %978 = vmatpush3.msra.mxu1 %v135_v31  ;;  %944 = vmatprep.subr.mxu0 %v118_v32  ;;  %v170_v22 = vld [vmem:[%s1982_s1 + $0x460] sm:$0xff]  ;;  %v185_v24 = vld [vmem:[%s1982_s1 + $0x4d8] sm:$0xff]  ;;  %v184_v28 = vld [vmem:[%s1982_s1 + $0x4d0] sm:$0xff] }
  0x34   :  { %979 = vmatprep.subr.mxu1 %v150_v33  ;;  %945 = vmatpush3.msra.mxu0 %v102_v34  ;;  %v202_v23 = vld [vmem:[%s1982_s1 + $0x560] sm:$0xff]  ;;  %v217_v25 = vld [vmem:[%s1982_s1 + $0x5d8] sm:$0xff]  ;;  %v216_v29 = vld [vmem:[%s1982_s1 + $0x5d0] sm:$0xff] }
  0x35   :  { %980 = vmatpush3.msra.mxu1 %v134_v35  ;;  %946 = vmatprep.subr.mxu0 %v117_v36  ;;  %v169_v26 = vld [vmem:[%s1982_s1 + $0x458] sm:$0xff]  ;;  %v168_v30 = vld [vmem:[%s1982_s1 + $0x450] sm:$0xff]  ;;  %v183_v32 = vld [vmem:[%s1982_s1 + $0x4c8] sm:$0xff] }
  0x36   :  { %981 = vmatprep.subr.mxu1 %v149_v37  ;;  %947 = vmatpush3.msra.mxu0 %v101_v38  ;;  %v201_v27 = vld [vmem:[%s1982_s1 + $0x558] sm:$0xff]  ;;  %v200_v31 = vld [vmem:[%s1982_s1 + $0x550] sm:$0xff]  ;;  %v215_v33 = vld [vmem:[%s1982_s1 + $0x5c8] sm:$0xff] }
  0x37   :  { %982 = vmatpush3.msra.mxu1 %v133_v39  ;;  %948 = vmatprep.subr.mxu0 %v116_v40  ;;  %v167_v34 = vld [vmem:[%s1982_s1 + $0x448] sm:$0xff]  ;;  %v182_v36 = vld [vmem:[%s1982_s1 + $0x4c0] sm:$0xff]  ;;  %v181_v40 = vld [vmem:[%s1982_s1 + $0x4b8] sm:$0xff] }
  0x38   :  { %983 = vmatprep.subr.mxu1 %v148_v41  ;;  %949 = vmatpush3.msra.mxu0 %v100_v42  ;;  %v199_v35 = vld [vmem:[%s1982_s1 + $0x548] sm:$0xff]  ;;  %v214_v37 = vld [vmem:[%s1982_s1 + $0x5c0] sm:$0xff]  ;;  %v213_v41 = vld [vmem:[%s1982_s1 + $0x5b8] sm:$0xff] }
  0x39   :  { %984 = vmatpush3.msra.mxu1 %v132_v43  ;;  %950 = vmatprep.subr.mxu0 %v115_v44  ;;  %v166_v38 = vld [vmem:[%s1982_s1 + $0x440] sm:$0xff]  ;;  %v165_v42 = vld [vmem:[%s1982_s1 + $0x438] sm:$0xff]  ;;  %v180_v44 = vld [vmem:[%s1982_s1 + $0x4b0] sm:$0xff] }
  0x3a   :  { %985 = vmatprep.subr.mxu1 %v147_v45  ;;  %951 = vmatpush3.msra.mxu0 %v99_v46  ;;  %v198_v39 = vld [vmem:[%s1982_s1 + $0x540] sm:$0xff]  ;;  %v197_v43 = vld [vmem:[%s1982_s1 + $0x538] sm:$0xff]  ;;  %v212_v45 = vld [vmem:[%s1982_s1 + $0x5b0] sm:$0xff] }
  0x3b   :  { %986 = vmatpush3.msra.mxu1 %v131_v47  ;;  %952 = vmatprep.subr.mxu0 %v114_v48  ;;  %v164_v46 = vld [vmem:[%s1982_s1 + $0x430] sm:$0xff]  ;;  %v179_v48 = vld [vmem:[%s1982_s1 + $0x4a8] sm:$0xff] }
  0x3c   :  { %987 = vmatprep.subr.mxu1 %v146_v49  ;;  %953 = vmatpush3.msra.mxu0 %v98_v50  ;;  %v196_v47 = vld [vmem:[%s1982_s1 + $0x530] sm:$0xff]  ;;  %v211_v49 = vld [vmem:[%s1982_s1 + $0x5a8] sm:$0xff] }
  0x3d   :  { %988 = vmatpush3.msra.mxu1 %v130_v51  ;;  %954 = vmatprep.subr.mxu0 %v113_v52  ;;  %v163_v50 = vld [vmem:[%s1982_s1 + $0x428] sm:$0xff]  ;;  %v178_v52 = vld [vmem:[%s1982_s1 + $0x4a0] sm:$0xff] }
  0x3e   :  { %989 = vmatprep.subr.mxu1 %v145_v53  ;;  %955 = vmatpush3.msra.mxu0 %v97_v54  ;;  %v195_v51 = vld [vmem:[%s1982_s1 + $0x528] sm:$0xff]  ;;  %v210_v53 = vld [vmem:[%s1982_s1 + $0x5a0] sm:$0xff] }
  0x3f   :  { %990 = vmatpush3.msra.mxu1 %v129_v55  ;;  %956 = vmatprep.subr.mxu0 %v112_v56  ;;  %v162_v54 = vld [vmem:[%s1982_s1 + $0x420] sm:$0xff]  ;;  %v177_v56 = vld [vmem:[%s1982_s1 + $0x498] sm:$0xff] }
  0x40   :  { %991 = vmatprep.subr.mxu1 %v144_v57  ;;  %957 = vmatpush3.msra.mxu0 %v96_v58  ;;  %v194_v55 = vld [vmem:[%s1982_s1 + $0x520] sm:$0xff]  ;;  %v209_v57 = vld [vmem:[%s1982_s1 + $0x598] sm:$0xff] }
  0x41   :  { %992 = vmatpush3.msra.mxu1 %v128_v59  ;;  %958 = vmatprep.subr.mxu0 %v111_v60  ;;  %v161_v58 = vld [vmem:[%s1982_s1 + $0x418] sm:$0xff]  ;;  %v176_v60 = vld [vmem:[%s1982_s1 + $0x490] sm:$0xff] }
  0x42   :  { %993 = vmatprep.subr.mxu1 %v143_v61  ;;  %959 = vmatpush3.msra.mxu0 %v95_v62  ;;  %v193_v59 = vld [vmem:[%s1982_s1 + $0x518] sm:$0xff]  ;;  %v208_v61 = vld [vmem:[%s1982_s1 + $0x590] sm:$0xff] }
  0x43   :  { %994 = vmatpush3.msra.mxu1 %v127_v63  ;;  %960 = vmatprep.subr.mxu0 %v110_v0  ;;  %v160_v62 = vld [vmem:[%s1982_s1 + $0x410] sm:$0xff]  ;;  %v175_v0 = vld [vmem:[%s1982_s1 + $0x488] sm:$0xff] }
  0x44   :  { %995 = vmatprep.subr.mxu1 %v142_v1  ;;  %961 = vmatpush3.msra.mxu0 %v94_v2  ;;  %v192_v63 = vld [vmem:[%s1982_s1 + $0x510] sm:$0xff]  ;;  %v207_v1 = vld [vmem:[%s1982_s1 + $0x588] sm:$0xff] }
  0x45   :  { %497 = vmatprep.mubr.f32.mxu0 %v19_v3  ;;  %996 = vmatpush3.msra.mxu1 %v126_v4  ;;  %v159_v2 = vld [vmem:[%s1982_s1 + $0x408] sm:$0xff]  ;;  %v174_v4 = vld [vmem:[%s1982_s1 + $0x480] sm:$0xff] }
  0x46   :  { %498 = vmatmul.mubr.f32.vlgmr.msra.gmra.mxu0 %v18_v5  ;;  %567 = vmatprep.mubr.f32.mxu1 %v21_v6  ;;  %v191_v3 = vld [vmem:[%s1982_s1 + $0x508] sm:$0xff]  ;;  %v206_v5 = vld [vmem:[%s1982_s1 + $0x580] sm:$0xff] }
  0x47   :  { %1000 = vmatprep.subr.mxu0 %v189_v7  ;;  %1035 = vmatprep.subr.mxu1 %v221_v8  ;;  %v158_v6 = vld [vmem:[%s1982_s1 + $0x400] sm:$0xff]  ;;  %v23_v7 = vld [vmem:[%s1983_s0 + $0x48] sm:$0xff] }
  0x48   :  { %568 = vmatmul.mubr.f32.vlgmr.msra.gmra.mxu1 %v20_v9  ;;  %1001 = vmatpush3.msra.mxu0 %v173_v10  ;;  %v190_v8 = vld [vmem:[%s1982_s1 + $0x500] sm:$0xff]  ;;  %v25_v10 = vld [vmem:[%s1983_s0 + $0x58] sm:$0xff] }
  0x49   :  { %1036 = vmatpush3.msra.mxu1 %v205_v11  ;;  %1002 = vmatprep.subr.mxu0 %v188_v12  ;;  %v22_v9 = vld [vmem:[%s1983_s0 + $0x40] sm:$0xff]  ;;  %v253_v11 = vld [vmem:[%s1982_s1 + $0x6f8] sm:$0xff] }
  0x4a   :  { %1037 = vmatprep.subr.mxu1 %v220_v13  ;;  %1003 = vmatpush3.msra.mxu0 %v172_v14  ;;  %v285_v12 = vld [vmem:[%s1982_s1 + $0x7f8] sm:$0xff]  ;;  %v24_v13 = vld [vmem:[%s1983_s0 + $0x50] sm:$0xff] }
  0x4b   :  { %1038 = vmatpush3.msra.mxu1 %v204_v15  ;;  %1004 = vmatprep.subr.mxu0 %v187_v16  ;;  %v237_v14 = vld [vmem:[%s1982_s1 + $0x678] sm:$0xff]  ;;  %v252_v16 = vld [vmem:[%s1982_s1 + $0x6f0] sm:$0xff] }
  0x4c   :  { %1039 = vmatprep.subr.mxu1 %v219_v17  ;;  %1005 = vmatpush3.msra.mxu0 %v171_v18  ;;  %v269_v15 = vld [vmem:[%s1982_s1 + $0x778] sm:$0xff]  ;;  %v284_v17 = vld [vmem:[%s1982_s1 + $0x7f0] sm:$0xff] }
  0x4d   :  { %1040 = vmatpush3.msra.mxu1 %v203_v19  ;;  %1006 = vmatprep.subr.mxu0 %v186_v20  ;;  %v236_v18 = vld [vmem:[%s1982_s1 + $0x670] sm:$0xff]  ;;  %v251_v20 = vld [vmem:[%s1982_s1 + $0x6e8] sm:$0xff] }
  0x4e   :  { %1041 = vmatprep.subr.mxu1 %v218_v21  ;;  %1007 = vmatpush3.msra.mxu0 %v170_v22  ;;  %v268_v19 = vld [vmem:[%s1982_s1 + $0x770] sm:$0xff]  ;;  %v283_v21 = vld [vmem:[%s1982_s1 + $0x7e8] sm:$0xff] }
  0x4f   :  { %1042 = vmatpush3.msra.mxu1 %v202_v23  ;;  %1008 = vmatprep.subr.mxu0 %v185_v24  ;;  %v235_v22 = vld [vmem:[%s1982_s1 + $0x668] sm:$0xff]  ;;  %v250_v24 = vld [vmem:[%s1982_s1 + $0x6e0] sm:$0xff] }
  0x50   :  { %1043 = vmatprep.subr.mxu1 %v217_v25  ;;  %1009 = vmatpush3.msra.mxu0 %v169_v26  ;;  %v267_v23 = vld [vmem:[%s1982_s1 + $0x768] sm:$0xff]  ;;  %v282_v25 = vld [vmem:[%s1982_s1 + $0x7e0] sm:$0xff] }
  0x51   :  { %1044 = vmatpush3.msra.mxu1 %v201_v27  ;;  %1010 = vmatprep.subr.mxu0 %v184_v28  ;;  %v234_v26 = vld [vmem:[%s1982_s1 + $0x660] sm:$0xff]  ;;  %v249_v28 = vld [vmem:[%s1982_s1 + $0x6d8] sm:$0xff] }
  0x52   :  { %1045 = vmatprep.subr.mxu1 %v216_v29  ;;  %1011 = vmatpush3.msra.mxu0 %v168_v30  ;;  %v266_v27 = vld [vmem:[%s1982_s1 + $0x760] sm:$0xff]  ;;  %v281_v29 = vld [vmem:[%s1982_s1 + $0x7d8] sm:$0xff] }
  0x53   :  { %1046 = vmatpush3.msra.mxu1 %v200_v31  ;;  %1012 = vmatprep.subr.mxu0 %v183_v32  ;;  %v233_v30 = vld [vmem:[%s1982_s1 + $0x658] sm:$0xff]  ;;  %v248_v32 = vld [vmem:[%s1982_s1 + $0x6d0] sm:$0xff] }
  0x54   :  { %1047 = vmatprep.subr.mxu1 %v215_v33  ;;  %1013 = vmatpush3.msra.mxu0 %v167_v34  ;;  %v265_v31 = vld [vmem:[%s1982_s1 + $0x758] sm:$0xff]  ;;  %v280_v33 = vld [vmem:[%s1982_s1 + $0x7d0] sm:$0xff] }
  0x55   :  { %1048 = vmatpush3.msra.mxu1 %v199_v35  ;;  %1014 = vmatprep.subr.mxu0 %v182_v36  ;;  %v232_v34 = vld [vmem:[%s1982_s1 + $0x650] sm:$0xff]  ;;  %v247_v36 = vld [vmem:[%s1982_s1 + $0x6c8] sm:$0xff] }
  0x56   :  { %1049 = vmatprep.subr.mxu1 %v214_v37  ;;  %1015 = vmatpush3.msra.mxu0 %v166_v38  ;;  %v264_v35 = vld [vmem:[%s1982_s1 + $0x750] sm:$0xff]  ;;  %v279_v37 = vld [vmem:[%s1982_s1 + $0x7c8] sm:$0xff] }
  0x57   :  { %1050 = vmatpush3.msra.mxu1 %v198_v39  ;;  %1016 = vmatprep.subr.mxu0 %v181_v40  ;;  %v231_v38 = vld [vmem:[%s1982_s1 + $0x648] sm:$0xff]  ;;  %v246_v40 = vld [vmem:[%s1982_s1 + $0x6c0] sm:$0xff] }
  0x58   :  { %1051 = vmatprep.subr.mxu1 %v213_v41  ;;  %1017 = vmatpush3.msra.mxu0 %v165_v42  ;;  %v263_v39 = vld [vmem:[%s1982_s1 + $0x748] sm:$0xff]  ;;  %v278_v41 = vld [vmem:[%s1982_s1 + $0x7c0] sm:$0xff] }
  0x59   :  { %1052 = vmatpush3.msra.mxu1 %v197_v43  ;;  %1018 = vmatprep.subr.mxu0 %v180_v44  ;;  %v230_v42 = vld [vmem:[%s1982_s1 + $0x640] sm:$0xff]  ;;  %v245_v44 = vld [vmem:[%s1982_s1 + $0x6b8] sm:$0xff] }
  0x5a   :  { %1053 = vmatprep.subr.mxu1 %v212_v45  ;;  %1019 = vmatpush3.msra.mxu0 %v164_v46  ;;  %v262_v43 = vld [vmem:[%s1982_s1 + $0x740] sm:$0xff]  ;;  %v277_v45 = vld [vmem:[%s1982_s1 + $0x7b8] sm:$0xff] }
  0x5b   :  { %1054 = vmatpush3.msra.mxu1 %v196_v47  ;;  %1020 = vmatprep.subr.mxu0 %v179_v48  ;;  %v229_v46 = vld [vmem:[%s1982_s1 + $0x638] sm:$0xff]  ;;  %v244_v48 = vld [vmem:[%s1982_s1 + $0x6b0] sm:$0xff] }
  0x5c   :  { %1055 = vmatprep.subr.mxu1 %v211_v49  ;;  %1021 = vmatpush3.msra.mxu0 %v163_v50  ;;  %v261_v47 = vld [vmem:[%s1982_s1 + $0x738] sm:$0xff]  ;;  %v276_v49 = vld [vmem:[%s1982_s1 + $0x7b0] sm:$0xff] }
  0x5d   :  { %1056 = vmatpush3.msra.mxu1 %v195_v51  ;;  %1022 = vmatprep.subr.mxu0 %v178_v52  ;;  %v228_v50 = vld [vmem:[%s1982_s1 + $0x630] sm:$0xff]  ;;  %v243_v52 = vld [vmem:[%s1982_s1 + $0x6a8] sm:$0xff] }
  0x5e   :  { %1057 = vmatprep.subr.mxu1 %v210_v53  ;;  %1023 = vmatpush3.msra.mxu0 %v162_v54  ;;  %v260_v51 = vld [vmem:[%s1982_s1 + $0x730] sm:$0xff]  ;;  %v275_v53 = vld [vmem:[%s1982_s1 + $0x7a8] sm:$0xff] }
  0x5f   :  { %1058 = vmatpush3.msra.mxu1 %v194_v55  ;;  %1024 = vmatprep.subr.mxu0 %v177_v56  ;;  %v227_v54 = vld [vmem:[%s1982_s1 + $0x628] sm:$0xff]  ;;  %v242_v56 = vld [vmem:[%s1982_s1 + $0x6a0] sm:$0xff] }
  0x60   :  { %1059 = vmatprep.subr.mxu1 %v209_v57  ;;  %1025 = vmatpush3.msra.mxu0 %v161_v58  ;;  %v259_v55 = vld [vmem:[%s1982_s1 + $0x728] sm:$0xff]  ;;  %v274_v57 = vld [vmem:[%s1982_s1 + $0x7a0] sm:$0xff] }
  0x61   :  { %1060 = vmatpush3.msra.mxu1 %v193_v59  ;;  %1026 = vmatprep.subr.mxu0 %v176_v60  ;;  %v226_v58 = vld [vmem:[%s1982_s1 + $0x620] sm:$0xff]  ;;  %v241_v60 = vld [vmem:[%s1982_s1 + $0x698] sm:$0xff] }
  0x62   :  { %1061 = vmatprep.subr.mxu1 %v208_v61  ;;  %1027 = vmatpush3.msra.mxu0 %v160_v62  ;;  %v258_v59 = vld [vmem:[%s1982_s1 + $0x720] sm:$0xff]  ;;  %v273_v61 = vld [vmem:[%s1982_s1 + $0x798] sm:$0xff] }
  0x63   :  { %1062 = vmatpush3.msra.mxu1 %v192_v63  ;;  %1028 = vmatprep.subr.mxu0 %v175_v0  ;;  %v225_v62 = vld [vmem:[%s1982_s1 + $0x618] sm:$0xff]  ;;  %v240_v0 = vld [vmem:[%s1982_s1 + $0x690] sm:$0xff] }
  0x64   :  { %1063 = vmatprep.subr.mxu1 %v207_v1  ;;  %1029 = vmatpush3.msra.mxu0 %v159_v2  ;;  %v257_v63 = vld [vmem:[%s1982_s1 + $0x718] sm:$0xff]  ;;  %v272_v1 = vld [vmem:[%s1982_s1 + $0x790] sm:$0xff] }
  0x65   :  { %1064 = vmatpush3.msra.mxu1 %v191_v3  ;;  %1030 = vmatprep.subr.mxu0 %v174_v4  ;;  %v224_v2 = vld [vmem:[%s1982_s1 + $0x610] sm:$0xff]  ;;  %v239_v4 = vld [vmem:[%s1982_s1 + $0x688] sm:$0xff] }
  0x66   :  { %1065 = vmatprep.subr.mxu1 %v206_v5  ;;  %1031 = vmatpush3.msra.mxu0 %v158_v6  ;;  %v256_v3 = vld [vmem:[%s1982_s1 + $0x710] sm:$0xff]  ;;  %v271_v5 = vld [vmem:[%s1982_s1 + $0x788] sm:$0xff] }
  0x67   :  { %637 = vmatprep.mubr.f32.mxu0 %v23_v7  ;;  %1066 = vmatpush3.msra.mxu1 %v190_v8  ;;  %v223_v6 = vld [vmem:[%s1982_s1 + $0x608] sm:$0xff]  ;;  %v238_v8 = vld [vmem:[%s1982_s1 + $0x680] sm:$0xff] }
  0x68   :  { %638 = vmatmul.mubr.f32.vlgmr.msra.gmra.mxu0 %v22_v9  ;;  %707 = vmatprep.mubr.f32.mxu1 %v25_v10  ;;  %v255_v7 = vld [vmem:[%s1982_s1 + $0x708] sm:$0xff]  ;;  %v270_v9 = vld [vmem:[%s1982_s1 + $0x780] sm:$0xff] }
  0x69   :  { %1070 = vmatprep.subr.mxu0 %v253_v11  ;;  %1105 = vmatprep.subr.mxu1 %v285_v12  ;;  %v222_v10 = vld [vmem:[%s1982_s1 + $0x600] sm:$0xff]  ;;  %v27_v11 = vld [vmem:[%s1983_s0 + $0x68] sm:$0xff] }
  0x6a   :  { %708 = vmatmul.mubr.f32.vlgmr.msra.gmra.mxu1 %v24_v13  ;;  %1071 = vmatpush3.msra.mxu0 %v237_v14  ;;  %v254_v12 = vld [vmem:[%s1982_s1 + $0x700] sm:$0xff]  ;;  %v29_v13 = vld [vmem:[%s1983_s0 + $0x78] sm:$0xff] }
  0x6b   :  { %1106 = vmatpush3.msra.mxu1 %v269_v15  ;;  %1072 = vmatprep.subr.mxu0 %v252_v16  ;;  %v26_v14 = vld [vmem:[%s1983_s0 + $0x60] sm:$0xff]  ;;  %v28_v15 = vld [vmem:[%s1983_s0 + $0x70] sm:$0xff] }
  0x6c   :  { %1107 = vmatprep.subr.mxu1 %v284_v17  ;;  %1073 = vmatpush3.msra.mxu0 %v236_v18 }
  0x6d   :  { %1108 = vmatpush3.msra.mxu1 %v268_v19  ;;  %1074 = vmatprep.subr.mxu0 %v251_v20 }
  0x6e   :  { %1109 = vmatprep.subr.mxu1 %v283_v21  ;;  %1075 = vmatpush3.msra.mxu0 %v235_v22  ;;  %v859_v21 = vld [vmem:[%s1984_s2] ss:$0 sm:$0xff] }
  0x6f   :  { %1110 = vmatpush3.msra.mxu1 %v267_v23  ;;  %1076 = vmatprep.subr.mxu0 %v250_v24 }
  0x70   :  { %1111 = vmatprep.subr.mxu1 %v282_v25  ;;  %1077 = vmatpush3.msra.mxu0 %v234_v26 }
  0x71   :  { %1112 = vmatpush3.msra.mxu1 %v266_v27  ;;  %1078 = vmatprep.subr.mxu0 %v249_v28 }
  0x72   :  { %1113 = vmatprep.subr.mxu1 %v281_v29  ;;  %1079 = vmatpush3.msra.mxu0 %v233_v30 }
  0x73   :  { %1114 = vmatpush3.msra.mxu1 %v265_v31  ;;  %1080 = vmatprep.subr.mxu0 %v248_v32 }
  0x74   :  { %1115 = vmatprep.subr.mxu1 %v280_v33  ;;  %1081 = vmatpush3.msra.mxu0 %v232_v34 }
  0x75   :  { %1116 = vmatpush3.msra.mxu1 %v264_v35  ;;  %1082 = vmatprep.subr.mxu0 %v247_v36 }
  0x76   :  { %1117 = vmatprep.subr.mxu1 %v279_v37  ;;  %1083 = vmatpush3.msra.mxu0 %v231_v38 }
  0x77   :  { %1118 = vmatpush3.msra.mxu1 %v263_v39  ;;  %1084 = vmatprep.subr.mxu0 %v246_v40 }
  0x78   :  { %1119 = vmatprep.subr.mxu1 %v278_v41  ;;  %1085 = vmatpush3.msra.mxu0 %v230_v42 }
  0x79   :  { %1120 = vmatpush3.msra.mxu1 %v262_v43  ;;  %1086 = vmatprep.subr.mxu0 %v245_v44 }
  0x7a   :  { %1121 = vmatprep.subr.mxu1 %v277_v45  ;;  %1087 = vmatpush3.msra.mxu0 %v229_v46 }
  0x7b   :  { %1122 = vmatpush3.msra.mxu1 %v261_v47  ;;  %1088 = vmatprep.subr.mxu0 %v244_v48 }
  0x7c   :  { %1123 = vmatprep.subr.mxu1 %v276_v49  ;;  %1089 = vmatpush3.msra.mxu0 %v228_v50 }
  0x7d   :  { %1124 = vmatpush3.msra.mxu1 %v260_v51  ;;  %1090 = vmatprep.subr.mxu0 %v243_v52 }
  0x7e   :  { %1125 = vmatprep.subr.mxu1 %v275_v53  ;;  %1091 = vmatpush3.msra.mxu0 %v227_v54 }
  0x7f   :  { %1126 = vmatpush3.msra.mxu1 %v259_v55  ;;  %1092 = vmatprep.subr.mxu0 %v242_v56 }
  0x80   :  { %1127 = vmatprep.subr.mxu1 %v274_v57  ;;  %1093 = vmatpush3.msra.mxu0 %v226_v58 }
  0x81   :  { %1128 = vmatpush3.msra.mxu1 %v258_v59  ;;  %1094 = vmatprep.subr.mxu0 %v241_v60 }
  0x82   :  { %1129 = vmatprep.subr.mxu1 %v273_v61  ;;  %1095 = vmatpush3.msra.mxu0 %v225_v62 }
  0x83   :  { %1130 = vmatpush3.msra.mxu1 %v257_v63  ;;  %1096 = vmatprep.subr.mxu0 %v240_v0 }
  0x84   :  { %1131 = vmatprep.subr.mxu1 %v272_v1  ;;  %1097 = vmatpush3.msra.mxu0 %v224_v2 }
  0x85   :  { %1132 = vmatpush3.msra.mxu1 %v256_v3  ;;  %1098 = vmatprep.subr.mxu0 %v239_v4 }
  0x86   :  { %1133 = vmatprep.subr.mxu1 %v271_v5  ;;  %1099 = vmatpush3.msra.mxu0 %v223_v6 }
  0x87   :  { %1134 = vmatpush3.msra.mxu1 %v255_v7  ;;  %1100 = vmatprep.subr.mxu0 %v238_v8 }
  0x88   :  { %1135 = vmatprep.subr.mxu1 %v270_v9  ;;  %1101 = vmatpush3.msra.mxu0 %v222_v10 }
  0x89   :  { %777 = vmatprep.mubr.f32.mxu0 %v27_v11  ;;  %1136 = vmatpush3.msra.mxu1 %v254_v12 }
  0x8a   :  { %847 = vmatprep.mubr.f32.mxu1 %v29_v13  ;;  %778 = vmatmul.mubr.f32.vlgmr.msra.gmra.mxu0 %v26_v14 }
  0x8b   :  { %848 = vmatmul.mubr.f32.vlgmr.msra.gmra.mxu1 %v28_v15 }
  0xe4   :  { %v892_v16 = vpop.f32.mrf.mxu0 }
  0xe6   :  { %v927_v17 = vpop.f32.mrf.mxu1  ;;  %v893_v18 = vpop.f32.mrf.mxu0 }
  0xe7   :  { %v894_v20 = vadd.f32 %v893_v18, %v892_v16 }
  0xe8   :  { %v928_v22 = vpop.f32.mrf.mxu1 }
  0xe9   :  { %v360_v25 = vadd.f32 %v894_v20, %v859_v21  ;;  %v929_v26 = vadd.f32 %v928_v22, %v927_v17 }
  0xeb   :  { %v430_v30 = vadd.f32 %v929_v26, %v360_v25 }
 0x106   :  { %v962_v19 = vpop.f32.mrf.mxu0 }
 0x108   :  { %v997_v23 = vpop.f32.mrf.mxu1  ;;  %v963_v24 = vpop.f32.mrf.mxu0 }
 0x109   :  { %v964_v28 = vadd.f32 %v963_v24, %v962_v19 }
 0x10a   :  { %v998_v29 = vpop.f32.mrf.mxu1 }
 0x10b   :  { %v500_v33 = vadd.f32 %v964_v28, %v430_v30  ;;  %v999_v34 = vadd.f32 %v998_v29, %v997_v23 }
 0x10d   :  { %v570_v37 = vadd.f32 %v999_v34, %v500_v33 }
 0x128   :  { %v1032_v27 = vpop.f32.mrf.mxu0 }
 0x12a   :  { %v1067_v31 = vpop.f32.mrf.mxu1  ;;  %v1033_v32 = vpop.f32.mrf.mxu0 }
 0x12b   :  { %v1034_v35 = vadd.f32 %v1033_v32, %v1032_v27 }
 0x12c   :  { %v1068_v36 = vpop.f32.mrf.mxu1 }
 0x12d   :  { %v640_v38 = vadd.f32 %v1034_v35, %v570_v37  ;;  %v1069_v39 = vadd.f32 %v1068_v36, %v1067_v31 }
 0x12f   :  { %v710_v44 = vadd.f32 %v1069_v39, %v640_v38 }
 0x14a   :  { %v1102_v40 = vpop.f32.mrf.mxu0 }
 0x14b   :  { %v1137_v41 = vpop.f32.mrf.mxu1 }
 0x14c   :  { %v1103_v42 = vpop.f32.mrf.mxu0 }
 0x14d   :  { %v1138_v43 = vpop.f32.mrf.mxu1  ;;  %v1104_v45 = vadd.f32 %v1103_v42, %v1102_v40 }
 0x14e   :  { %v1139_v47 = vadd.f32 %v1138_v43, %v1137_v41 }
 0x14f   :  { %v780_v46 = vadd.f32 %v1104_v45, %v710_v44 }
 0x151   :  { %v850_v48 = vadd.f32 %v1139_v47, %v780_v46 }
 0x153   :  { %854 = vst.msk [vmem:[%s1985_s3] sm:$0xff] %vm853_vm0, %v850_v48 }

</bundles_post_ra>
